<compile_context>
chip_gen: v7x
topology: tpu7x:2x2x1
jax: 0.10.0
libtpu: 0.0.40
codegen_flags: <defaults>
</compile_context>

<pallas_src>
import functools

import jax
import jax.numpy as jnp
from jax.experimental import pallas as pl
from jax.experimental.pallas import tpu as pltpu

LANE = 128
VMEM_LIMIT = 32 << 20  # safe on v5e/v6e (128 MiB) and v7x (64 MiB physical)


def _round_up(x, m):
    return (x + m - 1) // m * m


# ---------------------------------------------------------------------------
# Kernel 1: feature transform  XW = X @ W   (small; computed once per layer)
# ---------------------------------------------------------------------------
def _feature_transform_kernel(x_ref, w_ref, o_ref):
    o_ref[...] = jnp.dot(
        x_ref[...], w_ref[...], preferred_element_type=jnp.float32
    ).astype(o_ref.dtype)


def feature_transform(x, w, *, tm, out_dtype=jnp.bfloat16):
    """x: (Np, Cin) f32, w: (Cin, Cp) f32  ->  (Np, Cp) bf16."""
    n, c_in = x.shape
    c_out = w.shape[1]
    return pl.pallas_call(
        _feature_transform_kernel,
        out_shape=jax.ShapeDtypeStruct((n, c_out), out_dtype),
        grid_spec=pltpu.PrefetchScalarGridSpec(
            num_scalar_prefetch=0,
            grid=(n // tm,),
            in_specs=[
                pl.BlockSpec((tm, c_in), lambda i: (i, 0)),
                pl.BlockSpec((c_in, c_out), lambda i: (0, 0)),
            ],
            out_specs=pl.BlockSpec((tm, c_out), lambda i: (i, 0)),
        ),
        compiler_params=pltpu.CompilerParams(
            dimension_semantics=("parallel",),
            vmem_limit_bytes=VMEM_LIMIT,
        ),
        cost_estimate=pl.CostEstimate(
            flops=2 * n * c_in * c_out,
            transcendentals=0,
            bytes_accessed=n * c_in * 4 + c_in * c_out * 4 + n * c_out * 2,
        ),
    )(x, w)


# ---------------------------------------------------------------------------
# Kernel 2: propagation  out = A_hat @ XW + b  [+ relu]
#   grid = (row blocks, k blocks)  -- k (reduction) axis last, f32 accumulator
# ---------------------------------------------------------------------------
def _propagate_kernel(a_ref, xw_ref, b_ref, o_ref, acc_ref, *, apply_relu):
    k = pl.program_id(1)

    @pl.when(k == 0)
    def _():
        acc_ref[...] = jnp.zeros_like(acc_ref)

    acc_ref[...] += jnp.dot(
        a_ref[...], xw_ref[...], preferred_element_type=jnp.float32
    )

    @pl.when(k == pl.num_programs(1) - 1)
    def _():
        out = acc_ref[...] + b_ref[...]          # f32 epilogue (v5e-friendly)
        if apply_relu:
            out = jnp.maximum(out, 0.0)
        o_ref[...] = out.astype(o_ref.dtype)


def propagate(a_hat, xw, b, *, tm, tk, apply_relu):
    """a_hat: (Np, Np) bf16, xw: (Np, Cp) bf16, b: (1, Cp) f32 -> (Np, Cp) f32."""
    n = a_hat.shape[0]
    c = xw.shape[1]
    kern = functools.partial(_propagate_kernel, apply_relu=apply_relu)
    bytes_accessed = (
        n * n * a_hat.dtype.itemsize          # A_hat streamed once
        + (n // tm) * n * c * xw.dtype.itemsize  # XW re-read per row block
        + n * c * 4                           # output write
    )
    return pl.pallas_call(
        kern,
        out_shape=jax.ShapeDtypeStruct((n, c), jnp.float32),
        grid_spec=pltpu.PrefetchScalarGridSpec(
            num_scalar_prefetch=0,
            grid=(n // tm, n // tk),
            in_specs=[
                pl.BlockSpec((tm, tk), lambda i, k: (i, k)),
                pl.BlockSpec((tk, c), lambda i, k: (k, 0)),
                pl.BlockSpec((1, c), lambda i, k: (0, 0)),
            ],
            out_specs=pl.BlockSpec((tm, c), lambda i, k: (i, 0)),
            scratch_shapes=[pltpu.VMEM((tm, c), jnp.float32)],
        ),
        compiler_params=pltpu.CompilerParams(
            dimension_semantics=("parallel", "arbitrary"),
            vmem_limit_bytes=VMEM_LIMIT,
        ),
        cost_estimate=pl.CostEstimate(
            flops=2 * n * n * c,
            transcendentals=0,
            bytes_accessed=bytes_accessed,
        ),
    )(a_hat, xw, b)


# ---------------------------------------------------------------------------
# Glue: GCN-normalized dense adjacency (built ONCE, padded, streamed as bf16).
# ---------------------------------------------------------------------------
def gcn_norm_adj(edge_index, num_nodes, num_nodes_padded, dtype=jnp.bfloat16):
    src = edge_index[0]
    dst = edge_index[1]
    loops = jnp.arange(num_nodes, dtype=edge_index.dtype)
    src = jnp.concatenate([src, loops])       # self-loops (only for real nodes)
    dst = jnp.concatenate([dst, loops])
    a = (
        jnp.zeros((num_nodes_padded, num_nodes_padded), jnp.float32)
        .at[dst, src]
        .add(1.0)
    )
    deg = a.sum(axis=1)                       # padded rows -> deg 0 -> zeroed out
    dinv = jnp.where(deg > 0.0, jax.lax.rsqrt(deg), 0.0)
    a_hat = dinv[:, None] * a * dinv[None, :]
    return a_hat.astype(dtype)


def precompute_adjacency(edge_index, num_nodes):
    """Build (and cache on the caller side) the padded, bf16 normalized adjacency."""
    n_pad = _round_up(max(num_nodes, LANE), LANE)
    return gcn_norm_adj(edge_index, num_nodes, n_pad)


def _pick_tiles(n_pad):
    tm = 256 if n_pad % 256 == 0 else 128
    if n_pad % 512 == 0:
        tk = 512
    elif n_pad % 256 == 0:
        tk = 256
    else:
        tk = 128
    return tm, tk


# ---------------------------------------------------------------------------
# Model wrapper
# ---------------------------------------------------------------------------
def gnn_forward(params, x, a_hat, *, num_communities):
    n, c_in = x.shape
    n_pad = a_hat.shape[0]
    tm, tk = _pick_tiles(n_pad)

    # Pad nodes to n_pad rows; pad channel dims to the 128-lane width.
    x_pad = jnp.pad(x.astype(jnp.float32), ((0, n_pad - n), (0, 0)))

    w1, b1, w2, b2 = params["w1"], params["b1"], params["w2"], params["b2"]
    c_hid = w1.shape[1]
    c_out = w2.shape[1]
    c_hid_p = _round_up(c_hid, LANE)
    c_out_p = _round_up(c_out, LANE)

    w1p = jnp.pad(w1, ((0, 0), (0, c_hid_p - c_hid)))
    b1p = jnp.pad(b1, ((0, 0), (0, c_hid_p - c_hid)))
    w2p = jnp.pad(w2, ((0, c_hid_p - c_hid), (0, c_out_p - c_out)))
    b2p = jnp.pad(b2, ((0, 0), (0, c_out_p - c_out)))

    # Layer 1: XW once, then tiled propagation with fused bias + relu epilogue.
    xw1 = feature_transform(x_pad, w1p, tm=tm)                      # bf16 (Np, Cp)
    h = propagate(a_hat, xw1, b1p, tm=tm, tk=tk, apply_relu=True)   # f32  (Np, Cp)
    # dropout(p=0.4) is identity in eval mode
    # TODO(synk): training-mode dropout not applied

    # Layer 2.
    xw2 = feature_transform(h, w2p, tm=tm)                          # bf16 (Np, Cp)
    out = propagate(a_hat, xw2, b2p, tm=tm, tk=tk, apply_relu=False)

    return out[:n, :num_communities]


def init_params(key, in_channels, hidden_channels, num_communities):
    k1, k2 = jax.random.split(key)

    def glorot(k, fan_in, fan_out):
        limit = jnp.sqrt(6.0 / (fan_in + fan_out))
        return jax.random.uniform(
            k, (fan_in, fan_out), jnp.float32, minval=-limit, maxval=limit
        )

    return {
        "w1": glorot(k1, in_channels, hidden_channels),
        "b1": jnp.zeros((1, hidden_channels), jnp.float32),
        "w2": glorot(k2, hidden_channels, num_communities),
        "b2": jnp.zeros((1, num_communities), jnp.float32),
    }


if __name__ == "__main__":
    key = jax.random.PRNGKey(0)
    k_x, k_e, k_p = jax.random.split(key, 3)

    num_nodes = 16
    in_channels = 8
    hidden_channels = 32
    num_communities = 4
    num_edges = 40

    x = jax.random.normal(k_x, (num_nodes, in_channels), jnp.float32)
    edge_index = jax.random.randint(k_e, (2, num_edges), 0, num_nodes, jnp.int32)

    params = init_params(k_p, in_channels, hidden_channels, num_communities)

    # A_hat built once and reused by both layers (and across forwards).
    a_hat = precompute_adjacency(edge_index, num_nodes)

    out = gnn_forward(params, x, a_hat, num_communities=num_communities)
    out = jax.block_until_ready(out)
    assert out.shape == (num_nodes, num_communities)
    assert bool(jnp.all(jnp.isfinite(out)))
    print("KERNEL_OK")
</pallas_src>

<mosaic_0001>
module attributes {stable_mosaic.version = 11 : i64} {
  func.func @_feature_transform_kernel(%arg0: i32, %arg1: memref<128x8xf32, #tpu.memory_space<vmem>>, %arg2: memref<8x128xf32, #tpu.memory_space<vmem>>, %arg3: memref<128x128xbf16, #tpu.memory_space<vmem>>) attributes {dimension_semantics = [#tpu.dimension_semantics<parallel>], iteration_bounds = array<i64: 1>, scalar_prefetch = 0 : i64, scratch_operands = 0 : i64, tpu.core_type = #tpu.core_type<tc>, window_params = [{transform_indices = @transform_0, window_bounds = array<i64: 128, 8>}, {pipeline_mode = #tpu.pipeline_mode<synchronous>, transform_indices = @transform_1, window_bounds = array<i64: 8, 128>}, {transform_indices = @transform_2, window_bounds = array<i64: 128, 128>}]} {
    %c0 = arith.constant 0 : index
    %c0_0 = arith.constant 0 : index
    %0 = vector.load %arg1[%c0, %c0_0] : memref<128x8xf32, #tpu.memory_space<vmem>>, vector<128x8xf32>
    %c0_1 = arith.constant 0 : index
    %c0_2 = arith.constant 0 : index
    %1 = vector.load %arg2[%c0_1, %c0_2] : memref<8x128xf32, #tpu.memory_space<vmem>>, vector<8x128xf32>
    %cst = arith.constant dense<0.000000e+00> : vector<128x128xf32>
    %2 = tpu.matmul %0, %1, %cst {dimension_numbers = #tpu.dot_dimension_numbers<[1], [0], [0], [1], [0, 0, 1, 1], [], []>} : vector<128x8xf32>, vector<8x128xf32>, vector<128x128xf32> -> vector<128x128xf32>
    %3 = arith.truncf %2 : vector<128x128xf32> to vector<128x128xbf16>
    %c0_3 = arith.constant 0 : index
    %c0_4 = arith.constant 0 : index
    %4 = vector.load %arg3[%c0_3, %c0_4] : memref<128x128xbf16, #tpu.memory_space<vmem>>, vector<128x128xbf16>
    tpu.vector_store %arg3[%c0_3, %c0_4], %3 {strides = array<i32>} : memref<128x128xbf16, #tpu.memory_space<vmem>>, vector<128x128xbf16>,
    return
  }
  func.func @transform_0(%arg0: i32) -> (i32, i32) {
    %c0_i32 = arith.constant 0 : i32
    %c0_i32_0 = arith.constant 0 : i32
    return %arg0, %c0_i32 : i32, i32
  }
  func.func @transform_1(%arg0: i32) -> (i32, i32) {
    %c0_i32 = arith.constant 0 : i32
    %c0_i32_0 = arith.constant 0 : i32
    %c0_i32_1 = arith.constant 0 : i32
    return %c0_i32, %c0_i32_0 : i32, i32
  }
  func.func @transform_2(%arg0: i32) -> (i32, i32) {
    %c0_i32 = arith.constant 0 : i32
    %c0_i32_0 = arith.constant 0 : i32
    return %arg0, %c0_i32 : i32, i32
  }
}

</mosaic_0001>

<bundles_post_ra>
// kernel: tpu_custom_call.1
= control target key start
LH: loop header
LB: loop body
LE: loop exit
PB: predicated region body
PF: predicated region fallthrough
CT: control target
= control target key end

     0   :  { %vm29_vm0 = vcmask 64512   ;;  %s583_s0 = inlined_call_operand.vmem [shape: f32[128,8], index: 0, kind: input, shape index: {}]   ;;  %s584_s1 = inlined_call_operand.vmem [shape: f32[8,128], index: 1, kind: input, shape index: {}]   ;;  %s585_s2 = inlined_call_operand.hbm [shape: bf16[128,128], index: 2, kind: output, shape index: {}]  }
   0x1   :  { %v28_v0 = vld [vmem:[%s584_s1] sm:$0xff]  ;;  %v13_v3 = vld [vmem:[%s583_s0 + $0x8] sm:$0xff]  ;;  %v14_v5 = vld [vmem:[%s583_s0 + $0x10] sm:$0xff] }
   0x2   :  { %v12_v1 = vld [vmem:[%s583_s0] sm:$0xff]  ;;  %431 = vmatprep.subr.mxu0 %v28_v0  ;;  %457 = vmatprep.subr.mxu1 %v28_v0  ;;  %v21_v4 = vld [vmem:[%s583_s0 + $0x48] sm:$0xff]  ;;  %v22_v6 = vld [vmem:[%s583_s0 + $0x50] sm:$0xff] }
   0x3   :  { %v20_v2 = vld [vmem:[%s583_s0 + $0x40] sm:$0xff]  ;;  %432 = vmatpush3.msra.mxu0 %v28_v0  ;;  %458 = vmatpush3.msra.mxu1 %v28_v0  ;;  %v15_v7 = vld [vmem:[%s583_s0 + $0x18] sm:$0xff] }
   0x4   :  { %433 = vmatprep.mubr.msk.f32.mxu0 %vm29_vm0, %v12_v1  ;;  %445 = vmatprep.mubr.msk.f32.mxu1 %vm29_vm0, %v20_v2  ;;  %v23_v8 = vld [vmem:[%s583_s0 + $0x58] sm:$0xff] }
   0x5   :  { %434 = vmatmul.mubr.msk.f32.vlgmr.msra.gmra.mrb[0].mxu0 %vm29_vm0, %v13_v3  ;;  %446 = vmatmul.mubr.msk.f32.vlgmr.msra.gmra.mrb[0].mxu1 %vm29_vm0, %v21_v4 }
   0x6   :  { %436 = vmatprep.mubr.msk.f32.mxu0 %vm29_vm0, %v14_v5  ;;  %448 = vmatprep.mubr.msk.f32.mxu1 %vm29_vm0, %v22_v6 }
   0x7   :  { %7 = vsyncpa [#allocation3], 0  ;;  %v16_v9 = vld [vmem:[%s583_s0 + $0x20] sm:$0xff]  ;;  %v17_v11 = vld [vmem:[%s583_s0 + $0x28] sm:$0xff] }
   0x8   :  { %v24_v10 = vld [vmem:[%s583_s0 + $0x60] sm:$0xff]  ;;  %v25_v12 = vld [vmem:[%s583_s0 + $0x68] sm:$0xff]  ;;  %v18_v13 = vld [vmem:[%s583_s0 + $0x30] sm:$0xff] }
   0x9   :  { %437 = vmatmul.mubr.msk.f32.gmra.mrb[2].mxu0 %vm29_vm0, %v15_v7  ;;  %449 = vmatmul.mubr.msk.f32.gmra.mrb[2].mxu1 %vm29_vm0, %v23_v8  ;;  %v26_v14 = vld [vmem:[%s583_s0 + $0x70] sm:$0xff]  ;;  %v19_v15 = vld [vmem:[%s583_s0 + $0x38] sm:$0xff] }
   0xa   :  { %439 = vmatprep.mubr.msk.f32.mxu0 %vm29_vm0, %v16_v9  ;;  %451 = vmatprep.mubr.msk.f32.mxu1 %vm29_vm0, %v24_v10  ;;  %v27_v16 = vld [vmem:[%s583_s0 + $0x78] sm:$0xff]  ;;  %s486_s0 = smov [#allocation2]  }
   0xb   :  { %s308_s14 = sshll.u32 %s486_s0, 4  ;;  %s309_s14 = int_to_ptr.vmem [resolvable:$true] %s308_s14 }
   0xc   :  { %s462_s15 = scalar_lea.vmem %s309_s14, 1024  ;;  %p467_p1 = scmp.lt.s32.totalorder %s309_s14, %s309_s14 }
   0xd   :  { %440 = vmatmul.mubr.msk.f32.gmra.mrb[4].mxu0 %vm29_vm0, %v17_v11  ;;  %452 = vmatmul.mubr.msk.f32.gmra.mrb[4].mxu1 %vm29_vm0, %v25_v12  ;;  %p463_p0 = scmp.ne.s32.totalorder %s309_s14, %s462_s15  ;;  %p468_p2 = scmp.lt.s32.totalorder %s462_s15, %s462_s15 }
   0xe   :  { %442 = vmatprep.mubr.msk.f32.mxu0 %vm29_vm0, %v18_v13  ;;  %454 = vmatprep.mubr.msk.f32.mxu1 %vm29_vm0, %v26_v14 }
   0xf   :  { %p469_p3 = por %p468_p2, %p467_p1 }
  0x11   :  { %443 = vmatmul.mubr.msk.f32.gmra.mrb[6].mxu0 %vm29_vm0, %v19_v15  ;;  %455 = vmatmul.mubr.msk.f32.gmra.mrb[6].mxu1 %vm29_vm0, %v27_v16  ;;  %p470_p4 = pnand %p469_p3, %p463_p0 }
  0xd8   :  { %v435_v17 = vpop.f32.mrb[0].mxu0  ;;  %v447_v18 = vpop.f32.mrb[0].mxu1 }
  0xd9   :  { %v144_v19 = vpop.f32.mrb[1].mxu0  ;;  %v184_v20 = vpop.f32.mrb[1].mxu1 }
  0xda   :  { %v370_v21 = vpack.c.bf16 %v435_v17, %v144_v19  ;;  %v390_v22 = vpack.c.bf16 %v447_v18, %v184_v20 }
  0xdc   :  { %371 = vst [vmem:[#allocation2] sm:$0xff] %v370_v21   ;;  %410 = vst [vmem:[#allocation2 + $0x20] sm:$0xff] %v390_v22   ;;  %v438_v23 = vpop.f32.mrb[2].mxu0  ;;  %v450_v24 = vpop.f32.mrb[2].mxu1 }
  0xdd   :  { %v154_v25 = vpop.f32.mrb[3].mxu0  ;;  %v194_v26 = vpop.f32.mrb[3].mxu1 }
  0xde   :  { %v375_v27 = vpack.c.bf16 %v438_v23, %v154_v25  ;;  %v395_v28 = vpack.c.bf16 %v450_v24, %v194_v26 }
  0xe0   :  { %407 = vst [vmem:[#allocation2 + $0x8] sm:$0xff] %v375_v27   ;;  %411 = vst [vmem:[#allocation2 + $0x28] sm:$0xff] %v395_v28   ;;  %v441_v29 = vpop.f32.mrb[4].mxu0  ;;  %v453_v30 = vpop.f32.mrb[4].mxu1 }
  0xe1   :  { %v164_v31 = vpop.f32.mrb[5].mxu0  ;;  %v204_v32 = vpop.f32.mrb[5].mxu1 }
  0xe2   :  { %v380_v33 = vpack.c.bf16 %v441_v29, %v164_v31  ;;  %v400_v34 = vpack.c.bf16 %v453_v30, %v204_v32 }
  0xe4   :  { %408 = vst [vmem:[#allocation2 + $0x10] sm:$0xff] %v380_v33   ;;  %412 = vst [vmem:[#allocation2 + $0x30] sm:$0xff] %v400_v34   ;;  %v444_v35 = vpop.f32.mrb[6].mxu0  ;;  %v456_v36 = vpop.f32.mrb[6].mxu1 }
  0xe5   :  { %v174_v37 = vpop.f32.mrb[7].mxu0  ;;  %v214_v38 = vpop.f32.mrb[7].mxu1 }
  0xe6   :  { %v385_v39 = vpack.c.bf16 %v444_v35, %v174_v37  ;;  %v405_v40 = vpack.c.bf16 %v456_v36, %v214_v38 }
  0xe8   :  { %409 = vst [vmem:[#allocation2 + $0x18] sm:$0xff] %v385_v39   ;;  %413 = vst [vmem:[#allocation2 + $0x38] sm:$0xff] %v405_v40  }
  0xe9   :  { %473 = shalt.err (!%p470_p4)
}
  0xea   :  { %s474_s18 = scalar_lea.hbm %s585_s2, 1024 }
  0xeb   :  { %p475_p5 = scmp.ne.s32.totalorder %s585_s2, %s474_s18  ;;  %p478_p6 = scmp.lt.u32.totalorder %s474_s18, %s585_s2 }
  0xed   :  { %p480_p7 = pnand %p478_p6, %p475_p5 }
  0xef   :  { %483 = shalt.err (!%p480_p7)
}
  0xf0   :  { %s487_s22 = smov 64   ;;  %s488_s23 = smov 4  }
  0xf1   :  { %314 = dma.vmem_to_hbm [thread:$0]  %s309_s14, 1024, %s585_s2, [#allocation3], %s487_s22, %s487_s22, %s488_s23  }
  0xf2   :  { %484 = dma.done.wait [#allocation3], 1024  }
  0xf3   :  { %485 = vsyncadd [#allocation3], 4294966272 }
  0xf4   :  { %318 = vsyncpa [#allocation3], 1 }

</bundles_post_ra>
